<compile_context>
chip_gen: v7x
topology: tpu7x:2x2x1
jax: 0.10.0
libtpu: 0.0.40
codegen_flags: <defaults>
</compile_context>

<pallas_src>
import math
from functools import partial

import jax
import jax.numpy as jnp
from jax import lax
from jax.experimental import pallas as pl
from jax.experimental.pallas import tpu as pltpu

_LANE = 128
_SUBLANE = 8


def _round_up(x, m):
    return ((x + m - 1) // m) * m


def _pad2(a, rows, cols):
    a = a.astype(jnp.float32)
    return jnp.pad(a, ((0, rows - a.shape[0]), (0, cols - a.shape[1])))


def _normal_policy_kernel(x_ref, eps_ref, w1_ref, b1_ref, w2_ref, b2_ref,
                          w3_ref, b3_ref, std_ref, out_ref, *, lp_col):
    # ---- MLP (mu head): Linear -> tanh -> Linear -> tanh -> Linear ----
    h1 = jnp.tanh(
        jnp.dot(x_ref[...], w1_ref[...], preferred_element_type=jnp.float32)
        + b1_ref[...])
    h2 = jnp.tanh(
        jnp.dot(h1, w2_ref[...], preferred_element_type=jnp.float32)
        + b2_ref[...])
    mu = (jnp.dot(h2, w3_ref[...], preferred_element_type=jnp.float32)
          + b3_ref[...])

    # ---- Normal(mu, std): rsample + log_prob ----
    # TODO(synk): eps could be generated on-chip (pltpu.prng_seed +
    # stateful_normal) to drop one HBM input stream; kept as an explicit input
    # here so the result is bit-checkable against the pure-JAX reference.
    eps = eps_ref[...]                      # (TB, Ap), zero in padded lanes
    action = mu + std_ref[...] * eps        # reparameterized sample

    # (action - mu) == std * eps exactly, so the data-dependent part of the
    # summed log-prob is just sum(-0.5 * eps^2); padded lanes contribute 0.
    # The row-constant -(sum(log_std) + A*0.5*log(2*pi)) is added in the
    # wrapper.
    lp = jnp.sum(-0.5 * (eps * eps), axis=-1, keepdims=True)   # (TB, 1)

    # Lane-dense combined output slab: action in lanes [0, A), log-prob packed
    # into spare lane `lp_col` (== A).  One unmasked vst instead of a masked
    # [TB, 1] store.
    lane = lax.broadcasted_iota(jnp.int32, action.shape, 1)
    out_ref[...] = jnp.where(lane == lp_col, lp, action)


def normal_policy_forward(obs, params, log_std, eps, *, batch_tile=512):
    """obs: [B, D0] f32, eps: [B, A] f32. Returns (action [B, A], log_probs [B])."""
    (w1, b1), (w2, b2), (w3, b3) = params
    B, D0 = obs.shape
    H1 = w1.shape[1]
    H2 = w2.shape[1]
    A = w3.shape[1]

    # Lane-pad every feature dim to a multiple of 128; reserve one spare
    # output lane for the packed log-prob column.
    D0p = _round_up(D0, _LANE)
    H1p = _round_up(H1, _LANE)
    H2p = _round_up(H2, _LANE)
    Ap = _round_up(A + 1, _LANE)

    # Batch tiling: TB rows per grid step (sublane-aligned), grid over batch.
    tb = min(batch_tile, _round_up(B, _SUBLANE))
    tb = _round_up(tb, _SUBLANE)
    Bp = _round_up(B, tb)

    obs_p = _pad2(obs, Bp, D0p)
    eps_p = _pad2(eps, Bp, Ap)

    w1p = _pad2(w1, D0p, H1p)
    w2p = _pad2(w2, H1p, H2p)
    w3p = _pad2(w3, H2p, Ap)
    b1p = _pad2(b1.reshape(1, -1), 1, H1p)
    b2p = _pad2(b2.reshape(1, -1), 1, H2p)
    b3p = _pad2(b3.reshape(1, -1), 1, Ap)

    log_std = log_std.reshape(-1).astype(jnp.float32)
    std_p = _pad2(jnp.exp(log_std).reshape(1, -1), 1, Ap)   # exp hoisted out

    grid = (Bp // tb,)

    def row_spec(d):
        return pl.BlockSpec((tb, d), lambda i: (i, 0))

    def resident_spec(shape):
        # Constant index_map -> block stays VMEM-resident across grid steps.
        return pl.BlockSpec(shape, lambda i: (0, 0))

    out = pl.pallas_call(
        partial(_normal_policy_kernel, lp_col=A),
        out_shape=jax.ShapeDtypeStruct((Bp, Ap), jnp.float32),
        grid=grid,
        in_specs=[
            row_spec(D0p),               # obs tile
            row_spec(Ap),                # eps tile
            resident_spec(w1p.shape), resident_spec(b1p.shape),
            resident_spec(w2p.shape), resident_spec(b2p.shape),
            resident_spec(w3p.shape), resident_spec(b3p.shape),
            resident_spec(std_p.shape),
        ],
        out_specs=row_spec(Ap),
        compiler_params=pltpu.CompilerParams(
            dimension_semantics=("parallel",)),
    )(obs_p, eps_p, w1p, b1p, w2p, b2p, w3p, b3p, std_p)

    action = out[:B, :A]
    # Fold the row-constant part of the summed log-prob outside the kernel.
    lp_const = -(jnp.sum(log_std) + A * 0.5 * math.log(2.0 * math.pi))
    log_probs = out[:B, A] + lp_const
    return action, log_probs


def init_params(key, network_dims):
    """Deterministic init of Linear layers. Weights stored as [in, out]."""
    params = []
    keys = jax.random.split(key, len(network_dims) - 1)
    for k, (din, dout) in zip(keys, zip(network_dims[:-1], network_dims[1:])):
        kw, kb = jax.random.split(k)
        bound = 1.0 / math.sqrt(din)      # matches nn.Linear default init range
        w = jax.random.uniform(kw, (din, dout), jnp.float32, -bound, bound)
        b = jax.random.uniform(kb, (1, dout), jnp.float32, -bound, bound)
        params.append((w, b))
    return params


if __name__ == "__main__":
    # network_dims = [obs_dim, hidden, hidden, action_dim]
    network_dims = [16, 32, 32, 8]
    batch = 8

    key = jax.random.PRNGKey(0)
    k_obs, k_eps, k_params = jax.random.split(key, 3)

    obs = jax.random.normal(k_obs, (batch, network_dims[0]), jnp.float32)
    eps = jax.random.normal(k_eps, (batch, network_dims[-1]), jnp.float32)

    params = init_params(k_params, network_dims)
    log_std = -0.5 * jnp.ones((network_dims[-1],), jnp.float32)

    action, log_probs = normal_policy_forward(obs, params, log_std, eps)
    jax.block_until_ready((action, log_probs))

    # Pure-JAX reference check of the same math.
    def ref(obs, params, log_std, eps):
        (w1, b1), (w2, b2), (w3, b3) = params
        h = jnp.tanh(obs @ w1 + b1)
        h = jnp.tanh(h @ w2 + b2)
        mu = h @ w3 + b3
        std = jnp.exp(log_std)
        a = mu + std * eps
        lp = (-((a - mu) ** 2) / (2 * std * std) - log_std
              - 0.5 * math.log(2 * math.pi))
        return a, lp.sum(axis=-1)

    a_ref, lp_ref = ref(obs, params, log_std, eps)
    assert jnp.allclose(action, a_ref, atol=1e-5)
    assert jnp.allclose(log_probs, lp_ref, atol=1e-5)
    assert action.shape == (batch, network_dims[-1])
    assert log_probs.shape == (batch,)

    print("KERNEL_OK")
</pallas_src>

<mosaic_0001>
module attributes {stable_mosaic.version = 11 : i64} {
  func.func @_normal_policy_kernel(%arg0: i32, %arg1: memref<8x128xf32, #tpu.memory_space<vmem>>, %arg2: memref<8x128xf32, #tpu.memory_space<vmem>>, %arg3: memref<128x128xf32, #tpu.memory_space<vmem>>, %arg4: memref<1x128xf32, #tpu.memory_space<vmem>>, %arg5: memref<128x128xf32, #tpu.memory_space<vmem>>, %arg6: memref<1x128xf32, #tpu.memory_space<vmem>>, %arg7: memref<128x128xf32, #tpu.memory_space<vmem>>, %arg8: memref<1x128xf32, #tpu.memory_space<vmem>>, %arg9: memref<1x128xf32, #tpu.memory_space<vmem>>, %arg10: memref<8x128xf32, #tpu.memory_space<vmem>>) attributes {dimension_semantics = [#tpu.dimension_semantics<parallel>], iteration_bounds = array<i64: 1>, scalar_prefetch = 0 : i64, scratch_operands = 0 : i64, tpu.core_type = #tpu.core_type<tc>, window_params = [{transform_indices = @transform_0, window_bounds = array<i64: 8, 128>}, {transform_indices = @transform_1, window_bounds = array<i64: 8, 128>}, {pipeline_mode = #tpu.pipeline_mode<synchronous>, transform_indices = @transform_2, window_bounds = array<i64: 128, 128>}, {pipeline_mode = #tpu.pipeline_mode<synchronous>, transform_indices = @transform_3, window_bounds = array<i64: 1, 128>}, {pipeline_mode = #tpu.pipeline_mode<synchronous>, transform_indices = @transform_4, window_bounds = array<i64: 128, 128>}, {pipeline_mode = #tpu.pipeline_mode<synchronous>, transform_indices = @transform_5, window_bounds = array<i64: 1, 128>}, {pipeline_mode = #tpu.pipeline_mode<synchronous>, transform_indices = @transform_6, window_bounds = array<i64: 128, 128>}, {pipeline_mode = #tpu.pipeline_mode<synchronous>, transform_indices = @transform_7, window_bounds = array<i64: 1, 128>}, {pipeline_mode = #tpu.pipeline_mode<synchronous>, transform_indices = @transform_8, window_bounds = array<i64: 1, 128>}, {transform_indices = @transform_9, window_bounds = array<i64: 8, 128>}]} {
    %c0 = arith.constant 0 : index
    %c0_0 = arith.constant 0 : index
    %0 = vector.load %arg1[%c0, %c0_0] : memref<8x128xf32, #tpu.memory_space<vmem>>, vector<8x128xf32>
    %c0_1 = arith.constant 0 : index
    %c0_2 = arith.constant 0 : index
    %1 = vector.load %arg3[%c0_1, %c0_2] : memref<128x128xf32, #tpu.memory_space<vmem>>, vector<128x128xf32>
    %cst = arith.constant dense<0.000000e+00> : vector<8x128xf32>
    %2 = tpu.matmul %0, %1, %cst {dimension_numbers = #tpu.dot_dimension_numbers<[1], [0], [0], [1], [0, 0, 1, 1], [], []>} : vector<8x128xf32>, vector<128x128xf32>, vector<8x128xf32> -> vector<8x128xf32>
    %c0_3 = arith.constant 0 : index
    %c0_4 = arith.constant 0 : index
    %3 = vector.load %arg4[%c0_3, %c0_4] : memref<1x128xf32, #tpu.memory_space<vmem>>, vector<1x128xf32>
    %4 = vector.broadcast %3 : vector<1x128xf32> to vector<8x128xf32>
    %5 = arith.addf %2, %4 : vector<8x128xf32>
    %6 = math.tanh %5 : vector<8x128xf32>
    %c0_5 = arith.constant 0 : index
    %c0_6 = arith.constant 0 : index
    %7 = vector.load %arg5[%c0_5, %c0_6] : memref<128x128xf32, #tpu.memory_space<vmem>>, vector<128x128xf32>
    %cst_7 = arith.constant dense<0.000000e+00> : vector<8x128xf32>
    %8 = tpu.matmul %6, %7, %cst_7 {dimension_numbers = #tpu.dot_dimension_numbers<[1], [0], [0], [1], [0, 0, 1, 1], [], []>} : vector<8x128xf32>, vector<128x128xf32>, vector<8x128xf32> -> vector<8x128xf32>
    %c0_8 = arith.constant 0 : index
    %c0_9 = arith.constant 0 : index
    %9 = vector.load %arg6[%c0_8, %c0_9] : memref<1x128xf32, #tpu.memory_space<vmem>>, vector<1x128xf32>
    %10 = vector.broadcast %9 : vector<1x128xf32> to vector<8x128xf32>
    %11 = arith.addf %8, %10 : vector<8x128xf32>
    %12 = math.tanh %11 : vector<8x128xf32>
    %c0_10 = arith.constant 0 : index
    %c0_11 = arith.constant 0 : index
    %13 = vector.load %arg7[%c0_10, %c0_11] : memref<128x128xf32, #tpu.memory_space<vmem>>, vector<128x128xf32>
    %cst_12 = arith.constant dense<0.000000e+00> : vector<8x128xf32>
    %14 = tpu.matmul %12, %13, %cst_12 {dimension_numbers = #tpu.dot_dimension_numbers<[1], [0], [0], [1], [0, 0, 1, 1], [], []>} : vector<8x128xf32>, vector<128x128xf32>, vector<8x128xf32> -> vector<8x128xf32>
    %c0_13 = arith.constant 0 : index
    %c0_14 = arith.constant 0 : index
    %15 = vector.load %arg8[%c0_13, %c0_14] : memref<1x128xf32, #tpu.memory_space<vmem>>, vector<1x128xf32>
    %16 = vector.broadcast %15 : vector<1x128xf32> to vector<8x128xf32>
    %17 = arith.addf %14, %16 : vector<8x128xf32>
    %c0_15 = arith.constant 0 : index
    %c0_16 = arith.constant 0 : index
    %18 = vector.load %arg2[%c0_15, %c0_16] : memref<8x128xf32, #tpu.memory_space<vmem>>, vector<8x128xf32>
    %c0_17 = arith.constant 0 : index
    %c0_18 = arith.constant 0 : index
    %19 = vector.load %arg9[%c0_17, %c0_18] : memref<1x128xf32, #tpu.memory_space<vmem>>, vector<1x128xf32>
    %20 = vector.broadcast %19 : vector<1x128xf32> to vector<8x128xf32>
    %21 = arith.mulf %20, %18 : vector<8x128xf32>
    %22 = arith.addf %17, %21 : vector<8x128xf32>
    %23 = arith.mulf %18, %18 : vector<8x128xf32>
    %cst_19 = arith.constant -5.000000e-01 : f32
    %24 = vector.broadcast %cst_19 : f32 to vector<8x128xf32>
    %25 = arith.mulf %24, %23 : vector<8x128xf32>
    %cst_20 = arith.constant dense<0.000000e+00> : vector<8xf32>
    %26 = vector.multi_reduction <add>, %25, %cst_20 [1] : vector<8x128xf32> to vector<8xf32>
    %27 = vector.shape_cast %26 : vector<8xf32> to vector<8x1xf32>
    %28 = tpu.iota {dimensions = array<i32: 1>} : vector<8x128xi32>
    %c8_i32 = arith.constant 8 : i32
    %29 = vector.broadcast %c8_i32 : i32 to vector<8x128xi32>
    %30 = arith.cmpi eq, %28, %29 : vector<8x128xi32>
    %31 = vector.shape_cast %27 : vector<8x1xf32> to vector<8x1xf32>
    %32 = vector.broadcast %31 : vector<8x1xf32> to vector<8x128xf32>
    %33 = arith.select %30, %32, %22 : vector<8x128xi1>, vector<8x128xf32>
    %c0_21 = arith.constant 0 : index
    %c0_22 = arith.constant 0 : index
    %34 = vector.load %arg10[%c0_21, %c0_22] : memref<8x128xf32, #tpu.memory_space<vmem>>, vector<8x128xf32>
    tpu.vector_store %arg10[%c0_21, %c0_22], %33 {strides = array<i32>} : memref<8x128xf32, #tpu.memory_space<vmem>>, vector<8x128xf32>,
    return
  }
  func.func @transform_0(%arg0: i32) -> (i32, i32) {
    %c0_i32 = arith.constant 0 : i32
    %c0_i32_0 = arith.constant 0 : i32
    return %arg0, %c0_i32 : i32, i32
  }
  func.func @transform_1(%arg0: i32) -> (i32, i32) {
    %c0_i32 = arith.constant 0 : i32
    %c0_i32_0 = arith.constant 0 : i32
    return %arg0, %c0_i32 : i32, i32
  }
  func.func @transform_2(%arg0: i32) -> (i32, i32) {
    %c0_i32 = arith.constant 0 : i32
    %c0_i32_0 = arith.constant 0 : i32
    %c0_i32_1 = arith.constant 0 : i32
    return %c0_i32, %c0_i32_0 : i32, i32
  }
  func.func @transform_3(%arg0: i32) -> (i32, i32) {
    %c0_i32 = arith.constant 0 : i32
    %c0_i32_0 = arith.constant 0 : i32
    %c0_i32_1 = arith.constant 0 : i32
    return %c0_i32, %c0_i32_0 : i32, i32
  }
  func.func @transform_4(%arg0: i32) -> (i32, i32) {
    %c0_i32 = arith.constant 0 : i32
    %c0_i32_0 = arith.constant 0 : i32
    %c0_i32_1 = arith.constant 0 : i32
    return %c0_i32, %c0_i32_0 : i32, i32
  }
  func.func @transform_5(%arg0: i32) -> (i32, i32) {
    %c0_i32 = arith.constant 0 : i32
    %c0_i32_0 = arith.constant 0 : i32
    %c0_i32_1 = arith.constant 0 : i32
    return %c0_i32, %c0_i32_0 : i32, i32
  }
  func.func @transform_6(%arg0: i32) -> (i32, i32) {
    %c0_i32 = arith.constant 0 : i32
    %c0_i32_0 = arith.constant 0 : i32
    %c0_i32_1 = arith.constant 0 : i32
    return %c0_i32, %c0_i32_0 : i32, i32
  }
  func.func @transform_7(%arg0: i32) -> (i32, i32) {
    %c0_i32 = arith.constant 0 : i32
    %c0_i32_0 = arith.constant 0 : i32
    %c0_i32_1 = arith.constant 0 : i32
    return %c0_i32, %c0_i32_0 : i32, i32
  }
  func.func @transform_8(%arg0: i32) -> (i32, i32) {
    %c0_i32 = arith.constant 0 : i32
    %c0_i32_0 = arith.constant 0 : i32
    %c0_i32_1 = arith.constant 0 : i32
    return %c0_i32, %c0_i32_0 : i32, i32
  }
  func.func @transform_9(%arg0: i32) -> (i32, i32) {
    %c0_i32 = arith.constant 0 : i32
    %c0_i32_0 = arith.constant 0 : i32
    return %arg0, %c0_i32 : i32, i32
  }
}

</mosaic_0001>

<bundles_post_ra>
// kernel: tpu_custom_call.1
= control target key start
LH: loop header
LB: loop body
LE: loop exit
PB: predicated region body
PF: predicated region fallthrough
CT: control target
= control target key end

     0   :  { %14 = vsyncpa [#allocation3], 0  ;;  %s986_s0 = inlined_call_operand.hbm [shape: f32[8,128], index: 0, kind: input, shape index: {}]   ;;  %s987_s1 = inlined_call_operand.hbm [shape: f32[8,128], index: 1, kind: input, shape index: {}]   ;;  %s988_s2 = inlined_call_operand.hbm [shape: f32[128,128], index: 2, kind: input, shape index: {}]   ;;  %s989_s3 = inlined_call_operand.vmem [shape: f32[1,128], index: 3, kind: input, shape index: {}]   ;;  %s990_s4 = inlined_call_operand.hbm [shape: f32[128,128], index: 4, kind: input, shape index: {}]   ;;  %s991_s5 = inlined_call_operand.vmem [shape: f32[1,128], index: 5, kind: input, shape index: {}]   ;;  %s992_s6 = inlined_call_operand.hbm [shape: f32[128,128], index: 6, kind: input, shape index: {}]   ;;  %s993_s7 = inlined_call_operand.vmem [shape: f32[1,128], index: 7, kind: input, shape index: {}]   ;;  %s994_s8 = inlined_call_operand.vmem [shape: f32[1,128], index: 8, kind: input, shape index: {}]   ;;  %s995_s9 = inlined_call_operand.hbm [shape: f32[8,128], index: 9, kind: output, shape index: {}]  }
   0x1   :  { %15 = vsyncpa [#allocation6], 0 }
   0x2   :  { %16 = vsyncpa [#allocation9], 0 }
   0x3   :  { %17 = vsyncpa [#allocation4], 0  ;;  %s802_s30 = smov [#allocation5]   ;;  %s662_s13 = scalar_lea.hbm %s987_s1, 128 }
   0x4   :  { %s34_s10 = sshll.u32 %s802_s30, 4  ;;  %p663_p0 = scmp.ne.s32.totalorder %s987_s1, %s662_s13  ;;  %s35_s10 = int_to_ptr.vmem [resolvable:$true] %s34_s10 }
   0x5   :  { %p666_p1 = scmp.lt.u32.totalorder %s662_s13, %s987_s1 }
   0x7   :  { %p668_p2 = pnand %p666_p1, %p663_p0 }
   0x9   :  { %671 = shalt.err (!%p668_p2)
}
   0xa   :  { %s672_s18 = scalar_lea.vmem %s35_s10, 128  ;;  %p677_p4 = scmp.lt.s32.totalorder %s35_s10, %s35_s10 }
   0xb   :  { %p673_p3 = scmp.ne.s32.totalorder %s35_s10, %s672_s18  ;;  %p678_p5 = scmp.lt.s32.totalorder %s672_s18, %s672_s18 }
   0xd   :  { %p679_p6 = por %p678_p5, %p677_p4 }
   0xf   :  { %p680_p7 = pnand %p679_p6, %p673_p3 }
  0x11   :  { %683 = shalt.err (!%p680_p7)
}
  0x12   :  { %37 = dma.hbm_to_vmem [thread:$0]  %s987_s1, 128, %s35_s10, [#allocation6]  }
  0x13   :  { %s803_s21 = smov [#allocation8]   ;;  %s804_s23 = smov [#allocation2]  }
  0x14   :  { %s57_s22 = sshll.u32 %s803_s21, 4  ;;  %s24_s24 = sshll.u32 %s804_s23, 4  ;;  %s58_s22 = int_to_ptr.vmem [resolvable:$true] %s57_s22  ;;  %s25_s24 = int_to_ptr.vmem [resolvable:$true] %s24_s24 }
  0x15   :  { %s684_s27 = scalar_lea.hbm %s990_s4, 2048 }
  0x16   :  { %p685_p8 = scmp.ne.s32.totalorder %s990_s4, %s684_s27  ;;  %p688_p9 = scmp.lt.u32.totalorder %s684_s27, %s990_s4 }
  0x18   :  { %p690_p10 = pnand %p688_p9, %p685_p8 }
  0x1a   :  { %693 = shalt.err (!%p690_p10)
}
  0x1b   :  { %s694_s1 = scalar_lea.vmem %s58_s22, 2048  ;;  %p699_p12 = scmp.lt.s32.totalorder %s58_s22, %s58_s22 }
  0x1c   :  { %p695_p11 = scmp.ne.s32.totalorder %s58_s22, %s694_s1  ;;  %p700_p13 = scmp.lt.s32.totalorder %s694_s1, %s694_s1 }
  0x1e   :  { %p701_p0 = por %p700_p13, %p699_p12 }
  0x20   :  { %p702_p1 = pnand %p701_p0, %p695_p11 }
  0x22   :  { %705 = shalt.err (!%p702_p1)
}
  0x23   :  { %s805_s10 = smov 128   ;;  %s806_s12 = smov 8  }
  0x24   :  { %63 = dma.hbm_to_vmem [thread:$0]  %s990_s4, 2048, %s58_s22, [#allocation9], %s805_s10, %s805_s10, %s806_s12  }
  0x25   :  { %s706_s17 = scalar_lea.hbm %s986_s0, 128 }
  0x26   :  { %p707_p2 = scmp.ne.s32.totalorder %s986_s0, %s706_s17  ;;  %p710_p3 = scmp.lt.u32.totalorder %s706_s17, %s986_s0 }
  0x28   :  { %p712_p4 = pnand %p710_p3, %p707_p2 }
  0x2a   :  { %715 = shalt.err (!%p712_p4)
}
  0x2b   :  { %s716_s23 = scalar_lea.vmem %s25_s24, 128  ;;  %p721_p6 = scmp.lt.s32.totalorder %s25_s24, %s25_s24 }
  0x2c   :  { %p717_p5 = scmp.ne.s32.totalorder %s25_s24, %s716_s23  ;;  %p722_p7 = scmp.lt.s32.totalorder %s716_s23, %s716_s23 }
  0x2e   :  { %p723_p8 = por %p722_p7, %p721_p6 }
  0x30   :  { %p724_p9 = pnand %p723_p8, %p717_p5 }
  0x32   :  { %727 = shalt.err (!%p724_p9)
}
  0x33   :  { %27 = dma.hbm_to_vmem [thread:$0]  %s986_s0, 128, %s25_s24, [#allocation3]  }
  0x34   :  { %s807_s25 = smov [#allocation7]   ;;  %s808_s27 = smov [#allocation10]  }
  0x35   :  { %s43_s26 = sshll.u32 %s807_s25, 4  ;;  %s71_s28 = sshll.u32 %s808_s27, 4  ;;  %s44_s26 = int_to_ptr.vmem [resolvable:$true] %s43_s26  ;;  %s72_s28 = int_to_ptr.vmem [resolvable:$true] %s71_s28 }
  0x36   :  { %s728_s11 = scalar_lea.hbm %s988_s2, 2048 }
  0x37   :  { %p729_p10 = scmp.ne.s32.totalorder %s988_s2, %s728_s11  ;;  %p732_p11 = scmp.lt.u32.totalorder %s728_s11, %s988_s2 }
  0x39   :  { %p734_p12 = pnand %p732_p11, %p729_p10 }
  0x3b   :  { %737 = shalt.err (!%p734_p12)
}
  0x3c   :  { %s738_s0 = scalar_lea.vmem %s44_s26, 2048  ;;  %p743_p0 = scmp.lt.s32.totalorder %s44_s26, %s44_s26 }
  0x3d   :  { %p739_p13 = scmp.ne.s32.totalorder %s44_s26, %s738_s0  ;;  %p744_p1 = scmp.lt.s32.totalorder %s738_s0, %s738_s0 }
  0x3f   :  { %p745_p2 = por %p744_p1, %p743_p0 }
  0x41   :  { %p746_p3 = pnand %p745_p2, %p739_p13 }
  0x43   :  { %749 = shalt.err (!%p746_p3)
}
  0x44   :  { %49 = dma.hbm_to_vmem [thread:$0]  %s988_s2, 2048, %s44_s26, [#allocation6], %s805_s10, %s805_s10, %s806_s12  }
  0x45   :  { %s750_s19 = scalar_lea.hbm %s992_s6, 2048 }
  0x46   :  { %p751_p4 = scmp.ne.s32.totalorder %s992_s6, %s750_s19  ;;  %p754_p5 = scmp.lt.u32.totalorder %s750_s19, %s992_s6 }
  0x48   :  { %p756_p6 = pnand %p754_p5, %p751_p4 }
  0x4a   :  { %759 = shalt.err (!%p756_p6)
}
  0x4b   :  { %s760_s22 = scalar_lea.vmem %s72_s28, 2048  ;;  %p765_p8 = scmp.lt.s32.totalorder %s72_s28, %s72_s28 }
  0x4c   :  { %p761_p7 = scmp.ne.s32.totalorder %s72_s28, %s760_s22  ;;  %p766_p9 = scmp.lt.s32.totalorder %s760_s22, %s760_s22 }
  0x4e   :  { %p767_p10 = por %p766_p9, %p765_p8 }
  0x50   :  { %p768_p11 = pnand %p767_p10, %p761_p7 }
  0x52   :  { %771 = shalt.err (!%p768_p11)
}
  0x53   :  { %77 = dma.hbm_to_vmem [thread:$0]  %s992_s6, 2048, %s72_s28, [#allocation9], %s805_s10, %s805_s10, %s806_s12  }
  0x54   :  { %794 = dma.done.wait [#allocation3], 128  }
  0x55   :  { %795 = vsyncadd [#allocation3], 4294967168 }
  0x56   :  { %796 = dma.done.wait [#allocation6], 2176  }
  0x57   :  { %797 = vsyncadd [#allocation6], 4294965120 }
  0x58   :  { %798 = dma.done.wait [#allocation9], 4096  }
  0x59   :  { %799 = vsyncadd [#allocation9], 4294963200  ;;  %v809_v0 = vmov 0.0|0.0   ;;  %vm810_vm0 = vmmov 0   ;;  %v811_v1 = vmov 0.0   ;;  %v98_v2 = vld [vmem:[#allocation7] sm:$0xff] }
  0x5a   :  { %575 = vmatprep.subr.bf16.mxu0 %v809_v0  ;;  %502 = vmatprep.mubr.msk.f32.mxu0 %vm810_vm0, %v811_v1  ;;  %v99_v3 = vld [vmem:[#allocation7 + $0x8] sm:$0xff]  ;;  %v100_v4 = vld [vmem:[#allocation7 + $0x10] sm:$0xff]  ;;  %v101_v6 = vld [vmem:[#allocation7 + $0x18] sm:$0xff] }
  0x5b   :  { %599 = vmatprep.subr.bf16.mxu1 %v809_v0  ;;  %537 = vmatprep.mubr.msk.f32.mxu1 %vm810_vm0, %v811_v1  ;;  %v576_v5 = vpack.c.bf16 %v99_v3, %v98_v2  ;;  %v579_v7 = vpack.c.bf16 %v101_v6, %v100_v4  ;;  %v102_v8 = vld [vmem:[#allocation7 + $0x20] sm:$0xff]  ;;  %v103_v9 = vld [vmem:[#allocation7 + $0x28] sm:$0xff]  ;;  %v194_v12 = vld [vmem:[#allocation8 + $0x10] sm:$0xff] }
  0x5c   :  { %v192_v10 = vld [vmem:[#allocation8] sm:$0xff]  ;;  %v193_v11 = vld [vmem:[#allocation8 + $0x8] sm:$0xff]  ;;  %v195_v13 = vld [vmem:[#allocation8 + $0x18] sm:$0xff]  ;;  %v582_v14 = vpack.c.bf16 %v103_v9, %v102_v8 }
  0x5d   :  { %577 = vmatpush3.bf16.msra.mxu0 %v576_v5  ;;  %v600_v15 = vpack.c.bf16 %v193_v11, %v192_v10  ;;  %v104_v16 = vld [vmem:[#allocation7 + $0x30] sm:$0xff]  ;;  %v105_v17 = vld [vmem:[#allocation7 + $0x38] sm:$0xff]  ;;  %v603_v18 = vpack.c.bf16 %v195_v13, %v194_v12  ;;  %v196_v19 = vld [vmem:[#allocation8 + $0x20] sm:$0xff] }
  0x5e   :  { %578 = vmatprep.subr.bf16.mxu0 %v809_v0  ;;  %v197_v20 = vld [vmem:[#allocation8 + $0x28] sm:$0xff]  ;;  %v585_v21 = vpack.c.bf16 %v105_v17, %v104_v16  ;;  %v106_v22 = vld [vmem:[#allocation7 + $0x40] sm:$0xff]  ;;  %v198_v25 = vld [vmem:[#allocation8 + $0x30] sm:$0xff] }
  0x5f   :  { %601 = vmatpush3.bf16.msra.mxu1 %v600_v15  ;;  %v107_v23 = vld [vmem:[#allocation7 + $0x48] sm:$0xff]  ;;  %v606_v24 = vpack.c.bf16 %v197_v20, %v196_v19  ;;  %v199_v26 = vld [vmem:[#allocation8 + $0x38] sm:$0xff]  ;;  %v108_v28 = vld [vmem:[#allocation7 + $0x50] sm:$0xff] }
  0x60   :  { %602 = vmatprep.subr.bf16.mxu1 %v809_v0  ;;  %v588_v27 = vpack.c.bf16 %v107_v23, %v106_v22  ;;  %v109_v29 = vld [vmem:[#allocation7 + $0x58] sm:$0xff]  ;;  %v609_v30 = vpack.c.bf16 %v199_v26, %v198_v25  ;;  %v200_v31 = vld [vmem:[#allocation8 + $0x40] sm:$0xff]  ;;  %v201_v32 = vld [vmem:[#allocation8 + $0x48] sm:$0xff]  ;;  %v393_v25 = vlaneseq }
  0x61   :  { %580 = vmatpush3.bf16.msra.mxu0 %v579_v7  ;;  %v591_v33 = vpack.c.bf16 %v109_v29, %v108_v28  ;;  %v110_v34 = vld [vmem:[#allocation7 + $0x60] sm:$0xff]  ;;  %v111_v35 = vld [vmem:[#allocation7 + $0x68] sm:$0xff]  ;;  %v612_v36 = vpack.c.bf16 %v201_v32, %v200_v31  ;;  %v112_v38 = vld [vmem:[#allocation7 + $0x70] sm:$0xff] }
  0x62   :  { %581 = vmatprep.subr.bf16.mxu0 %v809_v0  ;;  %v594_v37 = vpack.c.bf16 %v111_v35, %v110_v34  ;;  %v113_v39 = vld [vmem:[#allocation7 + $0x78] sm:$0xff]  ;;  %v97_v41 = vld [vmem:[#allocation2] sm:$0xff]  ;;  %v204_v45 = vld [vmem:[#allocation8 + $0x60] sm:$0xff] }
  0x63   :  { %604 = vmatpush3.bf16.msra.mxu1 %v603_v18  ;;  %v597_v40 = vpack.c.bf16 %v113_v39, %v112_v38  ;;  %v202_v42 = vld [vmem:[#allocation8 + $0x50] sm:$0xff]  ;;  %v203_v43 = vld [vmem:[#allocation8 + $0x58] sm:$0xff]  ;;  %v205_v46 = vld [vmem:[#allocation8 + $0x68] sm:$0xff] }
  0x64   :  { %605 = vmatprep.subr.bf16.mxu1 %v809_v0  ;;  %v615_v44 = vpack.c.bf16 %v203_v43, %v202_v42  ;;  %v618_v47 = vpack.c.bf16 %v205_v46, %v204_v45  ;;  %v206_v48 = vld [vmem:[#allocation8 + $0x70] sm:$0xff]  ;;  %v207_v49 = vld [vmem:[#allocation8 + $0x78] sm:$0xff]  ;;  %v286_v51 = vld [vmem:[#allocation10] sm:$0xff] }
  0x65   :  { %583 = vmatpush3.bf16.msra.mxu0 %v582_v14  ;;  %v621_v50 = vpack.c.bf16 %v207_v49, %v206_v48  ;;  %v287_v52 = vld [vmem:[#allocation10 + $0x8] sm:$0xff]  ;;  %v288_v53 = vld [vmem:[#allocation10 + $0x10] sm:$0xff]  ;;  %v289_v55 = vld [vmem:[#allocation10 + $0x18] sm:$0xff] }
  0x66   :  { %584 = vmatprep.subr.bf16.mxu0 %v809_v0  ;;  %v624_v54 = vpack.c.bf16 %v287_v52, %v286_v51  ;;  %v627_v56 = vpack.c.bf16 %v289_v55, %v288_v53  ;;  %v290_v57 = vld [vmem:[#allocation10 + $0x20] sm:$0xff]  ;;  %v291_v58 = vld [vmem:[#allocation10 + $0x28] sm:$0xff]  ;;  %v292_v60 = vld [vmem:[#allocation10 + $0x30] sm:$0xff] }
  0x67   :  { %607 = vmatpush3.bf16.msra.mxu1 %v606_v24  ;;  %v630_v59 = vpack.c.bf16 %v291_v58, %v290_v57  ;;  %v293_v61 = vld [vmem:[#allocation10 + $0x38] sm:$0xff]  ;;  %v294_v63 = vld [vmem:[#allocation10 + $0x40] sm:$0xff]  ;;  %v415_v3 = vld [vmem:[%s989_s3] ss:$0 sm:$0xff] }
  0x68   :  { %608 = vmatprep.subr.bf16.mxu1 %v809_v0  ;;  %v633_v62 = vpack.c.bf16 %v293_v61, %v292_v60  ;;  %v296_v8 = vld [vmem:[#allocation10 + $0x50] sm:$0xff]  ;;  %v297_v9 = vld [vmem:[#allocation10 + $0x58] sm:$0xff]  ;;  %v298_v11 = vld [vmem:[#allocation10 + $0x60] sm:$0xff] }
  0x69   :  { %586 = vmatpush3.bf16.msra.mxu0 %v585_v21  ;;  %v639_v10 = vpack.c.bf16 %v297_v9, %v296_v8  ;;  %v299_v12 = vld [vmem:[#allocation10 + $0x68] sm:$0xff]  ;;  %v300_v14 = vld [vmem:[#allocation10 + $0x70] sm:$0xff]  ;;  %v301_v15 = vld [vmem:[#allocation10 + $0x78] sm:$0xff] }
  0x6a   :  { %587 = vmatprep.subr.bf16.mxu0 %v809_v0  ;;  %v642_v13 = vpack.c.bf16 %v299_v12, %v298_v11  ;;  %v645_v16 = vpack.c.bf16 %v301_v15, %v300_v14  ;;  %v379_v17 = vld [vmem:[#allocation5] sm:$0xff]  ;;  %v416_v20 = vld [vmem:[%s991_s5] ss:$0 sm:$0xff]  ;;  %s812_s5 = smov [#allocation11]  }
  0x6b   :  { %610 = vmatpush3.bf16.msra.mxu1 %v609_v30  ;;  %v389_v18 = vmul.f32 %v379_v17, %v379_v17  ;;  %v417_v26 = vld [vmem:[%s993_s7] ss:$0 sm:$0xff]  ;;  %s404_s30 = sshll.u32 %s812_s5, 4  ;;  %s405_s30 = int_to_ptr.vmem [resolvable:$true] %s404_s30 }
  0x6c   :  { %611 = vmatprep.subr.bf16.mxu1 %v809_v0  ;;  %s772_s11 = scalar_lea.vmem %s405_s30, 128  ;;  %p777_p13 = scmp.lt.s32.totalorder %s405_s30, %s405_s30 }
  0x6d   :  { %589 = vmatpush3.bf16.msra.mxu0 %v588_v27  ;;  %v390_v19 = vmul.f32 -0.5, %v389_v18  ;;  %v394_v27 = vand.u32 127, %v393_v25  ;;  %p773_p12 = scmp.ne.s32.totalorder %s405_s30, %s772_s11  ;;  %p778_p0 = scmp.lt.s32.totalorder %s772_s11, %s772_s11 }
  0x6e   :  { %590 = vmatprep.subr.bf16.mxu0 %v809_v0 }
  0x6f   :  { %613 = vmatpush3.bf16.msra.mxu1 %v612_v36  ;;  %391 = vadd.xlane.f32.xlu0 %v390_v19  ;;  %vm395_vm1 = vcmp.eq.s32.totalorder %v394_v27, 8  ;;  %p779_p1 = por %p778_p0, %p777_p13 }
  0x70   :  { %614 = vmatprep.subr.bf16.mxu1 %v809_v0 }
  0x71   :  { %592 = vmatpush3.bf16.msra.mxu0 %v591_v33  ;;  %p780_p2 = pnand %p779_p1, %p773_p12 }
  0x72   :  { %593 = vmatprep.subr.bf16.mxu0 %v809_v0 }
  0x73   :  { %616 = vmatpush3.bf16.msra.mxu1 %v615_v44 }
  0x74   :  { %617 = vmatprep.subr.bf16.mxu1 %v809_v0 }
  0x75   :  { %595 = vmatpush3.bf16.msra.mxu0 %v594_v37 }
  0x76   :  { %596 = vmatprep.subr.bf16.mxu0 %v809_v0 }
  0x77   :  { %619 = vmatpush3.bf16.msra.mxu1 %v618_v47 }
  0x78   :  { %620 = vmatprep.subr.bf16.mxu1 %v809_v0 }
  0x79   :  { %598 = vmatpush3.bf16.msra.mxu0 %v597_v40 }
  0x7a   :  { %623 = vmatprep.subr.bf16.mxu0 %v809_v0 }
  0x7b   :  { %622 = vmatpush3.bf16.msra.mxu1 %v621_v50 }
  0x7c   :  { %503 = vmatmul.mubr.f32.vlgmr.msra.gmra.mrb[0].mxu0 %v97_v41 }
  0x7d   :  { %572 = vmatprep.mubr.msk.f32.mxu0 %vm810_vm0, %v811_v1  ;;  %625 = vmatpush3.bf16.msra.mxu0 %v624_v54  ;;  %v295_v1 = vld [vmem:[#allocation10 + $0x48] sm:$0xff] }
  0x7e   :  { %626 = vmatprep.subr.bf16.mxu0 %v809_v0  ;;  %v636_v2 = vpack.c.bf16 %v295_v1, %v294_v63 }
  0x81   :  { %628 = vmatpush3.bf16.msra.mxu0 %v627_v56 }
  0x82   :  { %629 = vmatprep.subr.bf16.mxu0 %v809_v0 }
  0x85   :  { %631 = vmatpush3.bf16.msra.mxu0 %v630_v59 }
  0x86   :  { %632 = vmatprep.subr.bf16.mxu0 %v809_v0 }
  0x89   :  { %634 = vmatpush3.bf16.msra.mxu0 %v633_v62 }
  0x8a   :  { %635 = vmatprep.subr.bf16.mxu0 %v809_v0 }
  0x8d   :  { %637 = vmatpush3.bf16.msra.mxu0 %v636_v2 }
  0x8e   :  { %638 = vmatprep.subr.bf16.mxu0 %v809_v0 }
  0x91   :  { %640 = vmatpush3.bf16.msra.mxu0 %v639_v10 }
  0x92   :  { %641 = vmatprep.subr.bf16.mxu0 %v809_v0 }
  0x95   :  { %643 = vmatpush3.bf16.msra.mxu0 %v642_v13 }
  0x96   :  { %644 = vmatprep.subr.bf16.mxu0 %v809_v0  ;;  %v418_v0 = vld [vmem:[%s994_s8] ss:$0 sm:$0xff] }
  0x97   :  { %v387_v28 = vmul.f32 %v418_v0, %v379_v17 }
  0x99   :  { %646 = vmatpush3.bf16.msra.mxu0 %v645_v16 }
  0xfc   :  { %v392_v32 = vpop.xlane.xlu0 %391 }
 0x14f   :  { %v187_v4 = vpop.f32.mrb[0].mxu0 }
 0x150   :  { %v188_v5 = vadd.f32 %v415_v3, %v187_v4  ;;  %v504_v6 = vpop.f32.mrb[1].mxu0 }
 0x152   :  { %658 = vtanh.f32 %v188_v5 }
 0x15c   :  { %v659_v7 = vpop.eup %658 }
 0x15d   :  { %538 = vmatmul.mubr.f32.vlgmr.msra.gmra.mrb[0].mxu1 %v659_v7 }
 0x230   :  { %v281_v21 = vpop.f32.mrb[0].mxu1 }
 0x231   :  { %v282_v22 = vadd.f32 %v416_v20, %v281_v21  ;;  %v539_v23 = vpop.f32.mrb[1].mxu1 }
 0x233   :  { %660 = vtanh.f32 %v282_v22 }
 0x23d   :  { %v661_v24 = vpop.eup %660 }
 0x23e   :  { %573 = vmatmul.mubr.f32.vlgmr.msra.gmra.mrb[2].mxu0 %v661_v24 }
 0x311   :  { %v375_v29 = vpop.f32.mrb[2].mxu0 }
 0x312   :  { %v376_v30 = vadd.f32 %v417_v26, %v375_v29  ;;  %v574_v31 = vpop.f32.mrb[3].mxu0 }
 0x314   :  { %v388_v33 = vadd.f32 %v387_v28, %v376_v30 }
 0x316   :  { %v396_v34 = vsel %vm395_vm1, %v392_v32, %v388_v33 }
 0x317   :  { %397 = vst [vmem:[#allocation11] sm:$0xff] %v396_v34 }
 0x318   :  { %783 = shalt.err (!%p780_p2)
}
 0x319   :  { %s784_s1 = scalar_lea.hbm %s995_s9, 128 }
 0x31a   :  { %p785_p3 = scmp.ne.s32.totalorder %s995_s9, %s784_s1  ;;  %p788_p4 = scmp.lt.u32.totalorder %s784_s1, %s995_s9 }
 0x31c   :  { %p790_p5 = pnand %p788_p4, %p785_p3 }
 0x31e   :  { %793 = shalt.err (!%p790_p5)
}
 0x31f   :  { %407 = dma.vmem_to_hbm [thread:$0]  %s405_s30, 128, %s995_s9, [#allocation4]  }
 0x320   :  { %800 = dma.done.wait [#allocation4], 128  }
 0x321   :  { %801 = vsyncadd [#allocation4], 4294967168 }
 0x322   :  { %411 = vsyncpa [#allocation3], 1 }
 0x323   :  { %412 = vsyncpa [#allocation6], 1 }
 0x324   :  { %413 = vsyncpa [#allocation9], 1 }
 0x325   :  { %414 = vsyncpa [#allocation4], 1 }

</bundles_post_ra>
